<compile_context>
chip_gen: v5e
topology: v5e:2x2
jax: 0.10.0
libtpu: 0.0.40
codegen_flags: <defaults>
</compile_context>

<pallas_src>
import functools

import jax
import jax.numpy as jnp
from jax import lax
from jax.experimental import pallas as pl
from jax.experimental.pallas import tpu as pltpu


_EPS = 1e-12
_CHUNK = 8  # sublane-sized channel chunk for the in-kernel reduction


def _cdiv(a, b):
    return -(-a // b)


def _chip_config():
    """Returns (input_budget_bytes, vmem_limit_bytes, two_tensorcores)."""
    vmem = 64 << 20  # conservative default: v7x per-TC VMEM
    try:
        info = pltpu.get_tpu_info()
        vmem = int(getattr(info, "vmem_capacity_bytes", vmem))
    except Exception:
        pass
    two_core = vmem <= (64 << 20)  # v7x: 64 MiB/TC + 2 TCs; v5e/v6e: 128 MiB, 1 TC
    if two_core:
        return 16 << 20, 48 << 20, True
    return 48 << 20, 96 << 20, False


def _select_blocks(n, c, hw, itemsize, input_budget, two_core):
    """Pick (bn, nb, cb, kc) for cdiv-based batch/channel tiling."""
    sub = {1: 32, 2: 16}.get(itemsize, 8)    # sublane packing of the input dtype
    row = 2 * 2 * hw * itemsize              # 2 inputs, double-buffered, per (b, c) row

    # Batch block: as big as fits with full-C channel blocks.
    bn_limit = max(1, input_budget // max(1, row * c))
    if two_core and n >= 2:
        # v7x: at least 2 batch blocks so both TensorCores get work.
        bn_limit = min(bn_limit, _cdiv(n, 2))
    bn = max(1, min(n, bn_limit))
    nb = _cdiv(n, bn)
    if two_core and nb > 1 and nb % 2 == 1:
        # Nudge the 'parallel' extent even so both TCs get equal work.
        bn_alt = _cdiv(n, nb + 1)
        if bn_alt >= 1 and _cdiv(n, bn_alt) % 2 == 0:
            bn = bn_alt
            nb = _cdiv(n, bn)

    # Channel block: full C when it fits the budget; otherwise a sublane-pack
    # multiple (keeps the (8,128) BlockSpec constraint) with in-kernel masking
    # of the ragged tail.
    cb_limit = max(1, input_budget // max(1, row * bn))
    if cb_limit >= c:
        cb = c
    else:
        cb = min(c, max(sub, (cb_limit // sub) * sub))
    kc = _cdiv(c, cb)
    return bn, nb, cb, kc


# ----------------------------------------------------------------------------
# Kernel A: channel mean + L2 normalization (lane-dense, batch/channel tiled).
#   in : raw (bn, cb, HW), rect (bn, cb, HW)   [native dtype]
#   out: normed_raw (bn, 1, HW), normed_rect (bn, 1, HW)  [f32, resident over k]
# ----------------------------------------------------------------------------
def _mean_norm_kernel(raw_ref, rect_ref, nraw_ref, nrect_ref, *,
                      c_total, cb, kc, ragged_c, inv_c, eps):
    k = pl.program_id(1)
    bn = raw_ref.shape[0]
    hw = raw_ref.shape[2]

    n_full = cb // _CHUNK
    rem = cb % _CHUNK

    def block_sum(ref):
        """Channel-sum of this (bn, cb, hw) block, chunked over sublanes so the
        reduce never exceeds the vreg file (DMA stays the only busy slot)."""
        c_start = k * cb  # global channel offset of this block

        def piece(start, size, acc):
            sl = ref[:, pl.ds(start, size), :].astype(jnp.float32)
            if ragged_c:
                ch = lax.broadcasted_iota(jnp.int32, (1, size, 1), 1)
                sl = jnp.where(c_start + start + ch < c_total, sl, 0.0)
            return acc + jnp.sum(sl, axis=1, keepdims=True)

        acc = jnp.zeros((bn, 1, hw), jnp.float32)
        if n_full == 1:
            acc = piece(0, _CHUNK, acc)
        elif n_full > 1:
            def body(i, a):
                return piece(pl.multiple_of(i * _CHUNK, _CHUNK), _CHUNK, a)
            acc = lax.fori_loop(0, n_full, body, acc,
                                unroll=True if n_full <= 16 else 8)
        if rem:
            acc = piece(n_full * _CHUNK, rem, acc)
        return acc

    def finalize(sum_raw, sum_rect):
        m1 = sum_raw * inv_c
        m2 = sum_rect * inv_c
        ssq1 = jnp.sum(m1 * m1, axis=-1, keepdims=True)
        ssq2 = jnp.sum(m2 * m2, axis=-1, keepdims=True)
        # rsqrt goes to the EUP (free slot in this DMA-bound kernel); eps
        # guards the zero-map case (no divide, no NaN path).
        nraw_ref[...] = m1 * lax.rsqrt(ssq1 + eps)
        nrect_ref[...] = m2 * lax.rsqrt(ssq2 + eps)

    s_raw = block_sum(raw_ref)
    s_rect = block_sum(rect_ref)

    if kc == 1:
        # Untiled-C fast path (common case): one straight store, no RMW.
        finalize(s_raw, s_rect)
    else:
        @pl.when(k == 0)
        def _first():                 # direct write, no zero-init pass
            nraw_ref[...] = s_raw
            nrect_ref[...] = s_rect

        @pl.when(jnp.logical_and(k > 0, k < kc - 1))
        def _accum():
            nraw_ref[...] += s_raw
            nrect_ref[...] += s_rect

        @pl.when(k == kc - 1)
        def _last():
            finalize(nraw_ref[...] + s_raw, nrect_ref[...] + s_rect)


def _mean_and_normalize(raw3, rect3):
    n, c, hw = raw3.shape
    input_budget, vmem_limit, two_core = _chip_config()
    itemsize = jnp.dtype(raw3.dtype).itemsize
    bn, nb, cb, kc = _select_blocks(n, c, hw, itemsize, input_budget, two_core)

    kernel = functools.partial(
        _mean_norm_kernel,
        c_total=c, cb=cb, kc=kc, ragged_c=(c % cb) != 0,
        inv_c=1.0 / c, eps=_EPS)

    grid_spec = pltpu.PrefetchScalarGridSpec(
        num_scalar_prefetch=0,
        grid=(nb, kc),
        in_specs=[
            pl.BlockSpec((bn, cb, hw), lambda b, k: (b, k, 0)),
            pl.BlockSpec((bn, cb, hw), lambda b, k: (b, k, 0)),
        ],
        out_specs=[
            pl.BlockSpec((bn, 1, hw), lambda b, k: (b, 0, 0)),
            pl.BlockSpec((bn, 1, hw), lambda b, k: (b, 0, 0)),
        ],
    )
    out_shape = (
        jax.ShapeDtypeStruct((n, 1, hw), jnp.float32),
        jax.ShapeDtypeStruct((n, 1, hw), jnp.float32),
    )
    return pl.pallas_call(
        kernel,
        out_shape=out_shape,
        grid_spec=grid_spec,
        compiler_params=pltpu.CompilerParams(
            dimension_semantics=("parallel", "arbitrary"),
            vmem_limit_bytes=vmem_limit,
        ),
    )(raw3, rect3)


# ----------------------------------------------------------------------------
# Spectrum + rank/margin loss glue (plain JAX, fused by XLA).
# ----------------------------------------------------------------------------
def _gram_eigvals(m):
    """Eigenvalues of M M^T (or M^T M for tall maps) for each (H, W) map."""
    _, h, w = m.shape
    if h <= w:
        gram = jnp.einsum("bij,bkj->bik", m, m,
                          preferred_element_type=jnp.float32)   # M @ M^T
    else:
        gram = jnp.einsum("bji,bjk->bik", m, m,
                          preferred_element_type=jnp.float32)   # M^T @ M
    # TODO(synk): XLA's iterative eigh is the remaining wall-clock tail for
    # large N / small min(H,W); a fixed-iteration batched Jacobi sweep (or an
    # inertia count of G - tol^2*I) would remove it.
    return jnp.linalg.eigvalsh(gram)                             # (N, min(H, W))


def low_rank_loss(raw_feat, rectified_feat, *, tol=0.0, margin=0.0,
                  size_average=True, reduce=True, reverse=False,
                  use_exact_svd=False):
    assert raw_feat.shape == rectified_feat.shape
    n, c, h, w = raw_feat.shape

    # Flatten spatial dims so the kernel's lane dimension is H*W (lane-dense)
    # and stream the inputs in their NATIVE dtype (no wrapper astype copy).
    raw3 = raw_feat.reshape(n, c, h * w)
    rect3 = rectified_feat.reshape(n, c, h * w)
    if raw3.dtype != rect3.dtype:
        common = jnp.promote_types(raw3.dtype, rect3.dtype)
        raw3 = raw3.astype(common)
        rect3 = rect3.astype(common)

    normed_raw, normed_rect = _mean_and_normalize(raw3, rect3)
    normed_raw = normed_raw.reshape(n, h, w)
    normed_rect = normed_rect.reshape(n, h, w)

    tol = float(tol)
    if use_exact_svd:
        # TODO(synk): SVD/eigendecomposition has no Pallas/Mosaic lowering;
        # exact-parity fallback done with jnp.linalg.
        s1 = jnp.linalg.svd(normed_raw, compute_uv=False)
        s2 = jnp.linalg.svd(normed_rect, compute_uv=False)
        rank1 = jnp.sum((s1 > tol).astype(jnp.float32), axis=1)
        rank2 = jnp.sum((s2 > tol).astype(jnp.float32), axis=1)
    else:
        e1 = _gram_eigvals(normed_raw)
        e2 = _gram_eigvals(normed_rect)
        # sigma > tol  <=>  sigma^2 > tol^2 for tol >= 0: compare Gram
        # eigenvalues directly against tol^2 and skip the sqrt entirely.
        thresh = tol * tol if tol >= 0.0 else float("-inf")
        rank1 = jnp.sum((e1 > thresh).astype(jnp.float32), axis=1)   # (N,)
        rank2 = jnp.sum((e2 > thresh).astype(jnp.float32), axis=1)   # (N,)

    # margin_ranking_loss: max(0, -y * (x1 - x2) + margin), y = +/-1
    y = -1.0 if reverse else 1.0
    per_sample = jnp.maximum(-y * (rank1 - rank2) + margin, 0.0)

    if size_average:
        return jnp.sum(per_sample) / n
    elif reduce:
        return jnp.sum(per_sample)
    return per_sample


if __name__ == "__main__":
    key = jax.random.PRNGKey(0)
    k1, k2 = jax.random.split(key)
    N, C, H, W = 2, 4, 16, 16
    raw = jax.random.normal(k1, (N, C, H, W), dtype=jnp.float32)
    rect = jax.random.normal(k2, (N, C, H, W), dtype=jnp.float32)

    loss_fn = jax.jit(functools.partial(
        low_rank_loss, tol=0.0, margin=0.0,
        size_average=True, reduce=True, reverse=False))
    loss = loss_fn(raw, rect)
    jax.block_until_ready(loss)
    print("KERNEL_OK")
</pallas_src>

<mosaic_0001>
module attributes {stable_mosaic.version = 11 : i64} {
  func.func @_mean_norm_kernel(%arg0: i32, %arg1: i32, %arg2: memref<1x4x256xf32, #tpu.memory_space<vmem>>, %arg3: memref<1x4x256xf32, #tpu.memory_space<vmem>>, %arg4: memref<1x1x256xf32, #tpu.memory_space<vmem>>, %arg5: memref<1x1x256xf32, #tpu.memory_space<vmem>>) attributes {dimension_semantics = [#tpu.dimension_semantics<parallel>, #tpu.dimension_semantics<arbitrary>], iteration_bounds = array<i64: 2, 1>, scalar_prefetch = 0 : i64, scratch_operands = 0 : i64, tpu.core_type = #tpu.core_type<tc>, window_params = [{transform_indices = @transform_0, window_bounds = array<i64: 1, 4, 256>}, {transform_indices = @transform_1, window_bounds = array<i64: 1, 4, 256>}, {transform_indices = @transform_2, window_bounds = array<i64: 1, 1, 256>}, {transform_indices = @transform_3, window_bounds = array<i64: 1, 1, 256>}]} {
    %cst = arith.constant 0.000000e+00 : f32
    %0 = vector.broadcast %cst : f32 to vector<1x1x256xf32>
    %c0 = arith.constant 0 : index
    %c0_0 = arith.constant 0 : index
    %c0_1 = arith.constant 0 : index
    %1 = vector.load %arg2[%c0, %c0_0, %c0_1] : memref<1x4x256xf32, #tpu.memory_space<vmem>>, vector<1x4x256xf32>
    %cst_2 = arith.constant dense<0.000000e+00> : vector<1x256xf32>
    %2 = vector.multi_reduction <add>, %1, %cst_2 [1] : vector<1x4x256xf32> to vector<1x256xf32>
    %3 = vector.shape_cast %2 : vector<1x256xf32> to vector<1x1x256xf32>
    %4 = arith.addf %0, %3 : vector<1x1x256xf32>
    %cst_3 = arith.constant 0.000000e+00 : f32
    %5 = vector.broadcast %cst_3 : f32 to vector<1x1x256xf32>
    %c0_4 = arith.constant 0 : index
    %c0_5 = arith.constant 0 : index
    %c0_6 = arith.constant 0 : index
    %6 = vector.load %arg3[%c0_4, %c0_5, %c0_6] : memref<1x4x256xf32, #tpu.memory_space<vmem>>, vector<1x4x256xf32>
    %cst_7 = arith.constant dense<0.000000e+00> : vector<1x256xf32>
    %7 = vector.multi_reduction <add>, %6, %cst_7 [1] : vector<1x4x256xf32> to vector<1x256xf32>
    %8 = vector.shape_cast %7 : vector<1x256xf32> to vector<1x1x256xf32>
    %9 = arith.addf %5, %8 : vector<1x1x256xf32>
    %cst_8 = arith.constant 2.500000e-01 : f32
    %10 = vector.broadcast %cst_8 : f32 to vector<1x1x256xf32>
    %11 = arith.mulf %4, %10 : vector<1x1x256xf32>
    %cst_9 = arith.constant 2.500000e-01 : f32
    %12 = vector.broadcast %cst_9 : f32 to vector<1x1x256xf32>
    %13 = arith.mulf %9, %12 : vector<1x1x256xf32>
    %14 = arith.mulf %11, %11 : vector<1x1x256xf32>
    %cst_10 = arith.constant dense<0.000000e+00> : vector<1x1xf32>
    %15 = vector.multi_reduction <add>, %14, %cst_10 [2] : vector<1x1x256xf32> to vector<1x1xf32>
    %16 = vector.shape_cast %15 : vector<1x1xf32> to vector<1x1x1xf32>
    %17 = arith.mulf %13, %13 : vector<1x1x256xf32>
    %cst_11 = arith.constant dense<0.000000e+00> : vector<1x1xf32>
    %18 = vector.multi_reduction <add>, %17, %cst_11 [2] : vector<1x1x256xf32> to vector<1x1xf32>
    %19 = vector.shape_cast %18 : vector<1x1xf32> to vector<1x1x1xf32>
    %cst_12 = arith.constant 9.99999996E-13 : f32
    %20 = vector.broadcast %cst_12 : f32 to vector<1x1x1xf32>
    %21 = arith.addf %16, %20 : vector<1x1x1xf32>
    %22 = math.rsqrt %21 : vector<1x1x1xf32>
    %23 = vector.broadcast %22 : vector<1x1x1xf32> to vector<1x1x256xf32>
    %24 = arith.mulf %11, %23 : vector<1x1x256xf32>
    %c0_13 = arith.constant 0 : index
    %c0_14 = arith.constant 0 : index
    %c0_15 = arith.constant 0 : index
    %25 = vector.load %arg4[%c0_13, %c0_14, %c0_15] : memref<1x1x256xf32, #tpu.memory_space<vmem>>, vector<1x1x256xf32>
    tpu.vector_store %arg4[%c0_13, %c0_14, %c0_15], %24 {strides = array<i32>} : memref<1x1x256xf32, #tpu.memory_space<vmem>>, vector<1x1x256xf32>,
    %cst_16 = arith.constant 9.99999996E-13 : f32
    %26 = vector.broadcast %cst_16 : f32 to vector<1x1x1xf32>
    %27 = arith.addf %19, %26 : vector<1x1x1xf32>
    %28 = math.rsqrt %27 : vector<1x1x1xf32>
    %29 = vector.broadcast %28 : vector<1x1x1xf32> to vector<1x1x256xf32>
    %30 = arith.mulf %13, %29 : vector<1x1x256xf32>
    %c0_17 = arith.constant 0 : index
    %c0_18 = arith.constant 0 : index
    %c0_19 = arith.constant 0 : index
    %31 = vector.load %arg5[%c0_17, %c0_18, %c0_19] : memref<1x1x256xf32, #tpu.memory_space<vmem>>, vector<1x1x256xf32>
    tpu.vector_store %arg5[%c0_17, %c0_18, %c0_19], %30 {strides = array<i32>} : memref<1x1x256xf32, #tpu.memory_space<vmem>>, vector<1x1x256xf32>,
    return
  }
  func.func @transform_0(%arg0: i32, %arg1: i32) -> (i32, i32, i32) {
    %c0_i32 = arith.constant 0 : i32
    %c0_i32_0 = arith.constant 0 : i32
    return %arg0, %arg1, %c0_i32 : i32, i32, i32
  }
  func.func @transform_1(%arg0: i32, %arg1: i32) -> (i32, i32, i32) {
    %c0_i32 = arith.constant 0 : i32
    %c0_i32_0 = arith.constant 0 : i32
    return %arg0, %arg1, %c0_i32 : i32, i32, i32
  }
  func.func @transform_2(%arg0: i32, %arg1: i32) -> (i32, i32, i32) {
    %c0_i32 = arith.constant 0 : i32
    %c0_i32_0 = arith.constant 0 : i32
    %c0_i32_1 = arith.constant 0 : i32
    return %arg0, %c0_i32, %c0_i32_0 : i32, i32, i32
  }
  func.func @transform_3(%arg0: i32, %arg1: i32) -> (i32, i32, i32) {
    %c0_i32 = arith.constant 0 : i32
    %c0_i32_0 = arith.constant 0 : i32
    %c0_i32_1 = arith.constant 0 : i32
    return %arg0, %c0_i32, %c0_i32_0 : i32, i32, i32
  }
}

</mosaic_0001>

<bundles_post_ra>
// kernel: custom-call.4
= control target key start
LH: loop header
LB: loop body
LE: loop exit
PB: predicated region body
PF: predicated region fallthrough
CT: control target
= control target key end

     0   :  { %s2166_s0 = inlined_call_operand.vmem [shape: f32[2,8,8], index: 0, kind: input, shape index: {}]   ;;  %s2167_s1 = inlined_call_operand.vmem [shape: f32[2,8,8], index: 1, kind: input, shape index: {}]   ;;  %s2168_s2 = inlined_call_operand.vmem [shape: f32[2,8,8], index: 2, kind: input, shape index: {}]   ;;  %s2169_s3 = inlined_call_operand.vmem [shape: f32[2,8,8], index: 3, kind: input, shape index: {}]   ;;  %s2170_s4 = inlined_call_operand.vmem [shape: f32[2,8], index: 4, kind: output, shape index: {0}]   ;;  %s2171_s5 = inlined_call_operand.vmem [shape: f32[2,8], index: 5, kind: output, shape index: {1}]   ;;  %s2172_s6 = inlined_call_operand.hbm [shape: f32[2,8,8], index: 6, kind: output, shape index: {2}]   ;;  %s2173_s7 = inlined_call_operand.hbm [shape: f32[2,8,8], index: 7, kind: output, shape index: {3}]   ;;  %s2174_s8 = inlined_call_operand.hbm [shape: f32[2,8,8], index: 8, kind: output, shape index: {4}]   ;;  %s2175_s9 = inlined_call_operand.hbm [shape: f32[2,8,8], index: 9, kind: output, shape index: {5}]  }
   0x1   :  { %2176 = sst [smem:[#allocation32_spill]] %s2166_s0 }
   0x2   :  { %2177 = sst [smem:[#allocation33_spill]] %s2167_s1 }
   0x3   :  { %2178 = sst [smem:[#allocation34_spill]] %s2168_s2 }
   0x4   :  { %11 = vsyncpa [#allocation9], 0 }
   0x5   :  { %13 = vsyncpa [#allocation9 + $0x1], 0 }
   0x6   :  { %14 = vsyncpa [#allocation11], 0 }
   0x7   :  { %16 = vsyncpa [#allocation11 + $0x1], 0 }
   0x8   :  { %17 = vsyncpa [#allocation14], 0 }
   0x9   :  { %19 = vsyncpa [#allocation14 + $0x1], 0  ;;  %s1775_s30 = smov 0   ;;  %s1777_s10 = smov 0  }
   0xa   :  { %s1779_s11 = smov 0  }
   0xb LB: > { %s1791_s12 = sadd.s32 4294967295, %s1712_s11   ;;  %s1795_s14 = sadd.s32 1, %s1712_s11   ;;  %s1712_s11 = sphi %s1779_s11, %s2197_s11   ;;  %s1708_s10 = sphi %s1777_s10, %s2196_s10   ;;  %s1704_s30 = sphi %s1775_s30, %s2195_s30  }
   0xc   : > { %s29_s15 = sshrl.u32 %s1712_s11, 3  ;;  %s30_s16 = sshrl.u32 %s1795_s14, 3 }
   0xd   : > { %s34_s17 = sadd.s32 1, %s1708_s10  ;;  %s31_s18 = ssub.s32 %s29_s15, %s30_s16 }
   0xe   : > { %p44_p0 = scmp.ne.s32.totalorder %s1708_s10, %s1704_s30  ;;  %p32_p1 = scmp.eq.s32.totalorder %s31_s18, 0 }
   0xf   : > { %p45_p2 = scmp.eq.s32.totalorder %s1791_s12, 1  ;;  %p1460_p4 = scmp.ge.s32.totalorder %s1712_s11, 2 }
  0x10   : > { %s1804_s19 = scalar_select %p32_p1, %s1708_s10, %s34_s17  }
  0x11   : > { %p1806_p3 = por %p45_p2, %p44_p0  ;;  %95 = sbr.rel (%p1460_p4) target bundleno = 32 (0x20), region = 16 }
  0x12   : > { %2179 = sst [smem:[#allocation31_spill]] %s1804_s19  ;;  %s97_s21 = sand.u32 (!%p1460_p4), 1, %s1712_s11  }
  0x13   : > { %s1462_s22 = sshll.u32 (!%p1460_p4), %s1712_s11, 3  ;;  %s1461_s23 = sshll.u32 (!%p1460_p4), %s97_s21, 3 }
  0x14   : > { %s2181_s0 = sld [smem:[#allocation32_spill]] (!%p1460_p4)  ;;  %s99_s27 = scalar_lea.vmem (!%p1460_p4), [#allocation0], %s1461_s23 }
  0x15   : > { %s2182_s1 = sld [smem:[#allocation33_spill]] (!%p1460_p4)  ;;  %s138_s13 = scalar_lea.vmem (!%p1460_p4), [#allocation1], %s1461_s23 }
  0x16   : > { %s2183_s2 = sld [smem:[#allocation34_spill]]  ;;  %s218_s24 = scalar_lea.vmem %s2169_s3, %s1462_s22 }
  0x17   : > { %s177_s25 = scalar_lea.vmem [#allocation2], %s1461_s23  ;;  %v247_v3 = vld [vmem:[%s218_s24] sm:$0xff] }
  0x1a   : > { %s101_s26 = scalar_lea.vmem %s2181_s0, %s1462_s22 }
  0x1b   : > { %v130_v0 = vld [vmem:[%s101_s26] sm:$0xff]  ;;  %s140_s15 = scalar_lea.vmem %s2182_s1, %s1462_s22  ;;  %s216_s26 = scalar_lea.vmem [#allocation3], %s1461_s23 }
  0x1c   : > { %131 = vst [vmem:[%s99_s27] sm:$0xff] %v130_v0  ;;  %v169_v1 = vld [vmem:[%s140_s15] sm:$0xff]  ;;  %s179_s18 = scalar_lea.vmem %s2183_s2, %s1462_s22 }
  0x1d   : > { %170 = vst [vmem:[%s138_s13] sm:$0xff] %v169_v1  ;;  %v208_v2 = vld [vmem:[%s179_s18] sm:$0xff] }
  0x1e   : > { %209 = vst [vmem:[%s177_s25] sm:$0xff] %v208_v2 }
  0x1f   : > { %248 = vst [vmem:[%s216_s26] sm:$0xff] %v247_v3 }
  0x20 PF: > { %p1469_p5 = scmp.ge.s32.totalorder %s1712_s11, 1  ;;  %p253_p6 = scmp.lt.s32.totalorder %s1712_s11, 3 }
  0x22   : > { %p254_p7 = pnand %p1469_p5, %p253_p6 }
  0x24   : > { %257 = sbr.rel (%p254_p7) target bundleno = 1004 (0x3ec), region = 156 }
  0x29   : > { %s1830_s13 = sand.u32 1, %s1791_s12   ;;  %s294_s27 = sand.u32 1, %s1704_s30   ;;  %v342_v4 = vlaneseq  ;;  %v1722_v9 = vmov 0.0  }
  0x2a   : > { %s1834_s19 = sshll.u32 %s1830_s13, 3  ;;  %s1836_s22 = sshll.u32 %s294_s27, 1 }
  0x2b   : > { %v1838_v5 = vand.u32 127, %v342_v4  ;;  %v1840_v6 = vshrl.u32 %v342_v4, 7  ;;  %s262_s23 = scalar_lea.vmem [#allocation0], %s1834_s19  ;;  %s266_s28 = scalar_lea.vmem [#allocation1], %s1834_s19 }
  0x2c   : > { %v326_v7 = vld [vmem:[%s262_s23] sm:$0xff]  ;;  %v329_v8 = vld [vmem:[%s266_s28] sm:$0xff]  ;;  %s1845_s30 = scalar_lea.vmem [#allocation8], %s1834_s19  ;;  %s325_s29 = smov [#allocation15] }
  0x2d   : > { %337 = vst [vmem:[%s1845_s30] sm:$0xff] %v1722_v9  ;;  %s328_s15 = smov [#allocation16]  ;;  %s270_s16 = scalar_lea.vmem [#allocation2], %s1834_s19  ;;  %v344_v5 = vmov %v1838_v5  ;;  %v347_v6 = vmov %v1840_v6  ;;  %vm1349_vm2 = vcmp.lt.s32.totalorder %v1838_v5, 8 }
  0x2e   : > { %v332_v10 = vld [vmem:[%s270_s16] sm:$0xff]  ;;  %s1850_s17 = scalar_lea.vmem [#allocation10], %s1834_s19  ;;  %327 = vst [vmem:[%s325_s29] sm:$0xff] %v326_v7  ;;  %s331_s18 = smov [#allocation17]  ;;  %vm351_vm0 = vcmp.eq.s32.totalorder %v347_v6, %v344_v5  ;;  %v357_v5 = vmov %v1838_v5  ;;  %v360_v6 = vmov %v1840_v6 }
  0x2f   : > { %338 = vst [vmem:[%s1850_s17] sm:$0xff] %v1722_v9  ;;  %s334_s21 = smov [#allocation18]  ;;  %s274_s24 = scalar_lea.vmem [#allocation3], %s1834_s19  ;;  %vm364_vm1 = vcmp.eq.s32.totalorder %v360_v6, %v357_v5  ;;  %v1341_v5 = vmov %v1838_v5  ;;  %v1344_v6 = vmov %v1840_v6 }
  0x30   : > { %v335_v11 = vld [vmem:[%s274_s24] sm:$0xff]  ;;  %330 = vst [vmem:[%s328_s15] sm:$0xff] %v329_v8  ;;  %s341_s30 = smov %s1845_s30  ;;  %s1858_s25 = scalar_lea.vmem [#allocation12], %s1834_s19  ;;  %v1358_v5 = vmov %v1838_v5  ;;  %v1361_v6 = vmov %v1840_v6  ;;  %vm1354_vm3 = vcmp.eq.s32.totalorder %v1344_v6, %v1341_v5 }
  0x31   : > { %333 = vst [vmem:[%s331_s18] sm:$0xff] %v332_v10  ;;  %s1862_s26 = scalar_lea.vmem [#allocation13], %s1834_s19  ;;  %s1345_s28 = smov [#allocation15]  ;;  %v1375_v5 = vmov %v1838_v5  ;;  %v1378_v6 = vmov %v1840_v6 }
  0x32   : > { %336 = vst [vmem:[%s334_s21] sm:$0xff] %v335_v11  ;;  %s1362_s19 = smov [#allocation16]  ;;  %s1379_s29 = smov [#allocation17]  ;;  %v1392_v5 = vmov %v1838_v5  ;;  %v1395_v6 = vmov %v1840_v6 }
  0x33   : > { %339 = vst [vmem:[%s1858_s25] sm:$0xff] %v1722_v9  ;;  %s1396_s15 = smov [#allocation18]  ;;  %vm1405_vm4 = vcmp.eq.s32.totalorder %v1395_v6, %v1392_v5 }
  0x34   : > { %340 = vst [vmem:[%s1862_s26] sm:$0xff] %v1722_v9  ;;  %v348_v12 = vld [vmem:[%s341_s30] sm:$0xff]  ;;  %s354_s26 = smov %s1862_s26 }
  0x35   : > { %v352_v13 = vsel %vm351_vm0, 1.0, %v348_v12  ;;  %v1351_v16 = vld [vmem:[%s1345_s28] sm:$0xff] }
  0x36   : > { %353 = vst [vmem:[%s341_s30] sm:$0xff] %v352_v13  ;;  %v1352_v18 = vsel %vm1349_vm2, %v1351_v16, 0.0 }
  0x37   : > { %v1368_v17 = vld [vmem:[%s1362_s19] sm:$0xff]  ;;  %v1353_v22 = vmul.f32 %v1352_v18, %v1352_v18 }
  0x38   : > { %v1369_v19 = vsel %vm1349_vm2, %v1368_v17, 0.0  ;;  %v1385_v20 = vld [vmem:[%s1379_s29] sm:$0xff] }
  0x39   : > { %v1402_v21 = vld [vmem:[%s1396_s15] sm:$0xff]  ;;  %v1370_v23 = vmul.f32 %v1369_v19, %v1369_v19  ;;  %v1386_v24 = vsel %vm1349_vm2, %v1385_v20, 0.0  ;;  %v1355_v29 = vsel %vm1354_vm3, 0.0, %v1353_v22 }
  0x3a   : > { %v1403_v25 = vsel %vm1349_vm2, %v1402_v21, 0.0  ;;  %v1387_v26 = vmul.f32 %v1386_v24, %v1386_v24 }
  0x3b   : > { %v361_v14 = vld [vmem:[%s354_s26] sm:$0xff]  ;;  %v1372_v27 = vadd.f32 %v1370_v23, %v1353_v22  ;;  %v1404_v28 = vmul.f32 %v1403_v25, %v1403_v25  ;;  %v1371_v31 = vadd.f32 %v1370_v23, %v1355_v29 }
  0x3c   : > { %v365_v15 = vsel %vm364_vm1, 1.0, %v361_v14 }
  0x3d   : > { %366 = vst [vmem:[%s354_s26] sm:$0xff] %v365_v15  ;;  %v1389_v30 = vadd.f32 %v1387_v26, %v1372_v27  ;;  %v1388_v33 = vadd.f32 %v1387_v26, %v1371_v31  ;;  %v1406_v34 = vsel %vm1405_vm4, 0.0, %v1404_v28 }
  0x3f   : > { %v1408_v32 = vadd.f32 %v1404_v28, %v1389_v30  ;;  %v1407_v35 = vadd.f32 %v1406_v34, %v1388_v33 }
  0x41   : > { %1409 = vadd.xlane.f32.xlu0 %v1408_v32 }
  0x49   : > { %1417 = vadd.xlane.f32.xlu0 %v1407_v35 }
  0xb4   : > { %v1410_v36 = vpop.xlane.xlu0 %1409 }
  0xb5   : > { %v1411_v37 = vrot.slane %v1410_v36, 4 }
  0xb7   : > { %v1412_v38 = vadd.f32 %v1411_v37, %v1410_v36 }
  0xb9   : > { %v1413_v39 = vrot.slane %v1412_v38, 2 }
  0xbb   : > { %v1414_v43 = vadd.f32 %v1413_v39, %v1412_v38 }
  0xbc   : > { %v1418_v40 = vpop.xlane.xlu0 %1417 }
  0xbd   : > { %v1419_v41 = vrot.slane %v1418_v40, 4  ;;  %v1415_v46 = vrot.slane %v1414_v43, 1 }
  0xbf   : > { %v1420_v42 = vadd.f32 %v1419_v41, %v1418_v40  ;;  %v1416_v49 = vadd.f32 %v1415_v46, %v1414_v43 }
  0xc1   : > { %v1421_v44 = vrot.slane %v1420_v42, 2 }
  0xc3   : > { %v1422_v45 = vadd.f32 %v1421_v44, %v1420_v42 }
  0xc5   : > { %v1423_v47 = vrot.slane %v1422_v45, 1 }
  0xc7   : > { %v1424_v48 = vadd.f32 %v1423_v47, %v1422_v45 }
  0xc9   : > { %1510 = vpush %v1424_v48 }
  0xca   : > { %1512 = vpush %v1416_v49 }
  0xfa   : > { %s1511_s16 = spop %1510 }
  0xfb   : > { %s1513_s18 = spop %1512 }
  0xfc   : > { %s1427_s21 = smul.f32 1e-10, %s1513_s18 }
  0xfe   : > { %p1428_p8 = scmp.le.f32.partialorder %s1511_s16, %s1427_s21 }
  0xff   : > { %s1887_s24 = smov (!%p1428_p8), 0  }
 0x100   : > { %1431 = sbr.rel (%p1428_p8) target bundleno = 914 (0x392), region = 365 }
 0x105 LB: >> { %s1892_s28 = smov 0   ;;  %s1716_s24 = sphi %s1887_s24, %s2184_s24  }
 0x106 LB: >>> { %s471_s19 = smov [#allocation15]  ;;  %v475_v5 = vmov %v1838_v5  ;;  %v478_v6 = vmov %v1840_v6  ;;  %s491_s29 = smov [#allocation16]  ;;  %s1720_s28 = sphi %s1892_s28, %s470_s28  }
 0x107   : >>> { %v495_v5 = vmov %v1838_v5  ;;  %v498_v6 = vmov %v1840_v6  ;;  %v479_v50 = vld [vmem:[%s471_s19] sm:$0xff]  ;;  %vm482_vm5 = vcmp.eq.s32.totalorder %v478_v6, %v475_v5  ;;  %s511_s15 = smov [#allocation18]  ;;  %s472_s16 = smov [#allocation19] }
 0x108   : >>> { %vm502_vm6 = vcmp.eq.s32.totalorder %v498_v6, %v495_v5  ;;  %v515_v5 = vmov %v1838_v5  ;;  %v518_v6 = vmov %v1840_v6  ;;  %v483_v51 = vsel %vm482_vm5, %v479_v50, 0.0  ;;  %v499_v52 = vld [vmem:[%s491_s29] sm:$0xff]  ;;  %s492_s18 = smov [#allocation20]  ;;  %s512_s21 = smov [#allocation21] }
 0x109   : >>> { %vm522_vm7 = vcmp.eq.s32.totalorder %v518_v6, %v515_v5  ;;  %v484_v53 = vrot.slane %v483_v51, 4  ;;  %v503_v54 = vsel %vm502_vm6, %v499_v52, 0.0  ;;  %v519_v55 = vld [vmem:[%s511_s15] sm:$0xff]  ;;  %s535_s19 = smov [#allocation20]  ;;  %s533_s29 = smov [#allocation19]  ;;  %v624_v5 = vmov %v1838_v5 }
 0x10a   : >>> { %v504_v56 = vrot.slane %v503_v54, 4  ;;  %v523_v57 = vsel %vm522_vm7, %v519_v55, 0.0  ;;  %s537_s15 = smov [#allocation21]  ;;  %v627_v6 = vmov %v1840_v6  ;;  %s874_s23 = smov [#allocation26] }
 0x10b   : >>> { %v485_v58 = vadd.f32 %v484_v53, %v483_v51  ;;  %v524_v59 = vrot.slane %v523_v57, 4  ;;  %s1919_s30 = smov %s1845_s30  ;;  %s1922_s17 = smov %s1850_s17 }
 0x10c   : >>> { %v505_v60 = vadd.f32 %v504_v56, %v503_v54  ;;  %s1927_s25 = smov %s1858_s25  ;;  %s876_s27 = smov [#allocation27] }
 0x10d   : >>> { %v486_v61 = vrot.slane %v485_v58, 2  ;;  %v525_v62 = vadd.f32 %v524_v59, %v523_v57  ;;  %s1932_s26 = smov %s1862_s26  ;;  %s470_s28 = sadd.s32 1, %s1720_s28  }
 0x10e   : >>> { %v506_v63 = vrot.slane %v505_v60, 2  ;;  %p467_p9 = scmp.ge.s32.totalorder %s470_s28, 15  }
 0x10f   : >>> { %v487_v0 = vadd.f32 %v486_v61, %v485_v58  ;;  %v526_v1 = vrot.slane %v525_v62, 2 }
 0x110   : >>> { %v507_v2 = vadd.f32 %v506_v63, %v505_v60 }
 0x111   : >>> { %v488_v3 = vrot.slane %v487_v0, 1  ;;  %v527_v4 = vadd.f32 %v526_v1, %v525_v62 }
 0x112   : >>> { %v508_v7 = vrot.slane %v507_v2, 1 }
 0x113   : >>> { %v489_v8 = vadd.f32 %v488_v3, %v487_v0  ;;  %v528_v9 = vrot.slane %v527_v4, 1 }
 0x114   : >>> { %v509_v10 = vadd.f32 %v508_v7, %v507_v2 }
 0x115   : >>> { %490 = vst [vmem:[%s472_s16] sm:$0x1] %v489_v8  ;;  %v529_v11 = vadd.f32 %v528_v9, %v527_v4  ;;  %s612_s16 = smov [#allocation22] }
 0x116   : >>> { %510 = vst [vmem:[%s492_s18] sm:$0x1] %v509_v10  ;;  %s614_s18 = smov [#allocation23] }
 0x117   : >>> { %530 = vst [vmem:[%s512_s21] sm:$0x1] %v529_v11  ;;  %s531_s21 = smov [#allocation24] }
 0x118   : >>> { %s616_s21 = smov %s531_s21 }
 0x11c   : >>> { %v534_v19 = vld [vmem:[%s533_s29] sm:$0xff]  ;;  %s620_s29 = smov [#allocation24] }
 0x11d   : >>> { %v1903_v12 = vld [vmem:[%s535_s19] sm:$0xff]  ;;  %v588_v43 = vand.u32 2147483647, %v534_v19  ;;  %s532_s19 = smov [#allocation25] }
 0x11e   : >>> { %v540_v13 = vmul.f32 2.0, %v1903_v12  ;;  %v538_v20 = vld [vmem:[%s537_s15] sm:$0xff]  ;;  %v589_v51 = vand.u32 2147483647, %v1903_v12  ;;  %s618_s19 = smov %s532_s19  ;;  %s635_s15 = smov [#allocation25] }
 0x11f   : >>> { %v539_v23 = vsub.f32 %v538_v20, %v534_v19  ;;  %v590_v44 = vand.u32 2147483647, %v538_v20 }
 0x120   : >>> { %1566 = vrcp.f32 %v540_v13  ;;  %v552_v16 = vand.u32 2147483648, %v540_v13  ;;  %vm546_vm8 = vweird.f32 %v540_v13  ;;  %v550_v18 = vand.u32 2147483647, %v540_v13 }
 0x121   : >>> { %v591_v46 = vmin.f32 %v588_v43, %v590_v44 }
 0x122   : >>> { %v553_v22 = vor.u32 1.1754944e-38, %v552_v16  ;;  %vm551_vm11 = vcmp.eq.f32.partialorder %v550_v18, 8.507059e+37 }
 0x123   : >>> { %v592_v52 = vmul.f32 1.1920929e-08, %v591_v46 }
 0x125   : >>> { %vm593_vm4 = vcmp.le.f32.partialorder %v589_v51, %v592_v52 }
 0x126   : >>> { %v1567_v14 = vpop.eup %1566 }
 0x127   : >>> { %v542_v15 = vmul.f32 %v1567_v14, %v540_v13  ;;  %vm547_vm9 = vweird.f32 %v1567_v14 }
 0x128   : >>> { %vm548_vm10 = vmor %vm546_vm8, %vm547_vm9  ;;  %vm629_vm8 = vcmp.eq.s32.totalorder %v627_v6, %v624_v5  ;;  %v639_v5 = vmov %v1838_v5  ;;  %v642_v6 = vmov %v1840_v6 }
 0x129   : >>> { %v543_v17 = vsub.f32 1.0, %v542_v15  ;;  %vm644_vm9 = vcmp.eq.s32.totalorder %v642_v6, %v639_v5  ;;  %v710_v5 = vmov %v1838_v5 }
 0x12a   : >>> { %v751_v5 = vmov %v1838_v5 }
 0x12b   : >>> { %v544_v21 = vmul.f32 %v1567_v14, %v543_v17  ;;  %v737_v5 = vmov %v1838_v5 }
 0x12d   : >>> { %v545_v24 = vadd.f32 %v1567_v14, %v544_v21 }
 0x12f   : >>> { %v549_v25 = vsel %vm548_vm10, %v1567_v14, %v545_v24  ;;  %v884_v24 = vld [vmem:[%s1927_s25] sm:$0xff]  ;;  %vm834_vm10 = vcmp.eq.s32.totalorder %v1840_v6, 0 }
 0x130   : >>> { %v554_v26 = vsel %vm551_vm11, %v553_v22, %v549_v25  ;;  %vm846_vm11 = vcmp.eq.s32.totalorder %v1840_v6, 7  ;;  %v713_v6 = vmov %v1840_v6 }
 0x131   : >>> { %v555_v27 = vmul.f32 %v554_v26, %v539_v23  ;;  %v754_v6 = vmov %v1840_v6 }
 0x132   : >>> { %v740_v6 = vmov %v1840_v6 }
 0x133   : >>> { %v557_v28 = vmul.f32 %v555_v27, %v555_v27  ;;  %vm556_vm14 = vcmp.ge.f32.partialorder %v555_v27, 0.0 }
 0x135   : >>> { %v558_v29 = vadd.f32 1.0, %v557_v28 }
 0x137   : >>> { %1568 = vrsqrt.f32 %v558_v29  ;;  %vm566_vm12 = vcmp.eq.f32.partialorder %v558_v29, inf  ;;  %v569_v36 = vand.u32 2147483648, %v558_v29  ;;  %vm568_vm13 = vcmp.eq.f32.partialorder %v558_v29, 0.0 }
 0x13d   : >>> { %v1569_v30 = vpop.eup %1568 }
 0x13e   : >>> { %v560_v31 = vmul.f32 %v1569_v30, %v558_v29 }
 0x140   : >>> { %v561_v32 = vmul.f32 %v1569_v30, %v560_v31 }
 0x142   : >>> { %v562_v33 = vmul.f32 0.5, %v561_v32 }
 0x144   : >>> { %v563_v34 = vsub.f32 1.5, %v562_v33 }
 0x146   : >>> { %v564_v35 = vmul.f32 %v1569_v30, %v563_v34 }
 0x148   : >>> { %v565_v37 = vmul.f32 %v564_v35, %v558_v29 }
 0x14a   : >>> { %v567_v38 = vsel %vm566_vm12, %v558_v29, %v565_v37  ;;  %v885_v29 = vld [vmem:[%s1932_s26] sm:$0xff]  ;;  %vm718_vm12 = vcmp.eq.s32.totalorder %v713_v6, %v710_v5  ;;  %v724_v5 = vmov %v1838_v5  ;;  %v727_v6 = vmov %v1840_v6 }
 0x14b   : >>> { %v570_v39 = vsel %vm568_vm13, %v569_v36, %v567_v38  ;;  %vm759_vm13 = vcmp.eq.s32.totalorder %v754_v6, %v751_v5 }
 0x14c   : >>> { %v571_v40 = vxor.u32 2147483648, %v570_v39 }
 0x14e   : >>> { %v572_v41 = vsel %vm556_vm14, %v570_v39, %v571_v40  ;;  %vm744_vm14 = vcmp.eq.s32.totalorder %v740_v6, %v737_v5 }
 0x14f   : >>> { %v573_v42 = vadd.f32 %v572_v41, %v555_v27 }
 0x151   : >>> { %1570 = vrcp.f32 %v573_v42  ;;  %v585_v48 = vand.u32 2147483648, %v573_v42  ;;  %vm579_vm15 = vweird.f32 %v573_v42  ;;  %v583_v50 = vand.u32 2147483647, %v573_v42 }
 0x153   : >>> { %v586_v54 = vor.u32 1.1754944e-38, %v585_v48  ;;  %vm584_vm3 = vcmp.eq.f32.partialorder %v583_v50, 8.507059e+37 }
 0x157   : >>> { %v1571_v45 = vpop.eup %1570 }
 0x158   : >>> { %v575_v47 = vmul.f32 %v1571_v45, %v573_v42  ;;  %vm580_vm0 = vweird.f32 %v1571_v45 }
 0x159   : >>> { %vm581_vm1 = vmor %vm579_vm15, %vm580_vm0  ;;  %vm731_vm15 = vcmp.eq.s32.totalorder %v727_v6, %v724_v5  ;;  %vm790_vm0 = vcmp.eq.s32.totalorder %v1838_v5, 7  ;;  %v374_v6 = vmov (%p467_p9), %v1840_v6 }
 0x15a   : >>> { %v576_v49 = vsub.f32 1.0, %v575_v47 }
 0x15c   : >>> { %v577_v53 = vmul.f32 %v1571_v45, %v576_v49 }
 0x15e   : >>> { %v578_v55 = vadd.f32 %v1571_v45, %v577_v53 }
 0x160   : >>> { %v582_v56 = vsel %vm581_vm1, %v1571_v45, %v578_v55  ;;  %vm773_vm1 = vcmp.eq.s32.totalorder %v1838_v5, 0 }
 0x161   : >>> { %v587_v57 = vsel %vm584_vm3, %v586_v54, %v582_v56  ;;  %vm777_vm3 = vcmp.eq.s32.totalorder %v1838_v5, 1  ;;  %v371_v5 = vmov (%p467_p9), %v1838_v5 }
 0x162   : >>> { %v594_v58 = vsel %vm593_vm4, 0.0, %v587_v57  ;;  %vm386_vm4 = vcmp.eq.s32.totalorder (%p467_p9), %v374_v6, %v371_v5  ;;  %v390_v5 = vmov (%p467_p9), %v1838_v5  ;;  %v393_v6 = vmov (%p467_p9), %v1840_v6 }
 0x163   : >>> { %v595_v59 = vmul.f32 %v594_v58, %v594_v58  ;;  %v608_v60 = vmul.f32 %v594_v58, %v1903_v12  ;;  %v407_v5 = vmov (%p467_p9), %v1838_v5  ;;  %v410_v6 = vmov (%p467_p9), %v1840_v6 }
 0x164   : >> { %v424_v5 = vmov (%p467_p9), %v1838_v5  ;;  %v427_v6 = vmov (%p467_p9), %v1840_v6 }
 0x165   : >>> { %v596_v61 = vadd.f32 1.0, %v595_v59  ;;  %v609_v62 = vsub.f32 %v534_v19, %v608_v60  ;;  %v611_v63 = vadd.f32 %v608_v60, %v538_v20  ;;  %v882_v19 = vld [vmem:[%s1919_s30] sm:$0xff] }
 0x166   : >>> { %v883_v20 = vld [vmem:[%s1922_s17] sm:$0xff] }
 0x167   : >>> { %1572 = vrsqrt.f32 %v596_v61  ;;  %613 = vst [vmem:[%s612_s16] sm:$0xff] %v609_v62  ;;  %vm603_vm5 = vweird.f32 %v596_v61  ;;  %s633_s16 = smov [#allocation26] }
 0x168   : >>> { %615 = vst [vmem:[%s614_s18] sm:$0xff] %v611_v63  ;;  %s648_s18 = smov [#allocation27] }
 0x16d   : >>> { %v1573_v0 = vpop.eup %1572 }
 0x16e   : >>> { %v598_v1 = vmul.f32 %v1573_v0, %v596_v61  ;;  %vm604_vm6 = vweird.f32 %v1573_v0 }
 0x16f   : >>> { %vm605_vm7 = vmor %vm603_vm5, %vm604_vm6  ;;  %vm439_vm5 = vcmp.eq.s32.totalorder (%p467_p9), %v427_v6, %v424_v5 }
 0x170   : >>> { %v599_v2 = vmul.f32 %v1573_v0, %v598_v1 }
 0x172   : >>> { %v600_v3 = vmul.f32 0.5, %v599_v2 }
 0x174   : >>> { %v601_v4 = vsub.f32 1.5, %v600_v3 }
 0x176   : >>> { %v602_v7 = vmul.f32 %v1573_v0, %v601_v4 }
 0x178   : >>> { %v606_v8 = vsel %vm605_vm7, %v1573_v0, %v602_v7 }
 0x179   : >>> { %617 = vst [vmem:[%s616_s21] sm:$0xff] %v606_v8  ;;  %v607_v9 = vmul.f32 %v606_v8, %v594_v58  ;;  %s650_s21 = smov [#allocation26] }
 0x17b   : >>> { %619 = vst [vmem:[%s618_s19] sm:$0xff] %v607_v9  ;;  %s1912_s19 = smov [#allocation15] }
 0x17c   : >>> { %v658_v22 = vld [vmem:[%s1912_s19] sm:$0xff] }
 0x180   : >>> { %v621_v10 = vld [vmem:[%s620_s29] ss:$0 sm:$0xff]  ;;  %s1914_s29 = smov [#allocation16] }
 0x181   : >>> { %v630_v11 = vsel %vm629_vm8, %v621_v10, 0.0  ;;  %v659_v16 = vld [vmem:[%s1914_s29] sm:$0xff] }
 0x182   : >>> { %631 = vadd.xlane.f32.xlu0 %v630_v11  ;;  %v636_v12 = vld [vmem:[%s635_s15] ss:$0 sm:$0xff]  ;;  %s1916_s15 = smov [#allocation17] }
 0x183   : >>> { %v645_v13 = vsel %vm644_vm9, %v636_v12, 0.0  ;;  %v660_v17 = vld [vmem:[%s1916_s15] sm:$0xff] }
 0x18a   : >>> { %646 = vadd.xlane.f32.xlu0 %v645_v13 }
 0x1f5   : >>> { %v632_v14 = vpop.xlane.xlu0 %631 }
 0x1f6   : >>> { %634 = vst [vmem:[%s633_s16] sm:$0xff] %v632_v14  ;;  %s1924_s16 = smov [#allocation18] }
 0x1f7   : >>> { %v661_v23 = vld [vmem:[%s1924_s16] sm:$0xff] }
 0x1fd   : >>> { %v647_v15 = vpop.xlane.xlu0 %646  ;;  %v651_v18 = vld [vmem:[%s650_s21] sm:$0xff]  ;;  %s1946_s21 = smov [#allocation17] }
 0x1fe   : >>> { %649 = vst [vmem:[%s648_s18] sm:$0xff] %v647_v15  ;;  %s652_s18 = smov [#allocation27]  ;;  %v875_v21 = vld [vmem:[%s874_s23] sm:$0xff]  ;;  %v665_v25 = vmul.f32 %v659_v16, %v651_v18  ;;  %v669_v26 = vmul.f32 %v660_v17, %v651_v18  ;;  %v662_v46 = vmul.f32 %v658_v22, %v651_v18  ;;  %v672_v48 = vmul.f32 %v661_v23, %v651_v18  ;;  %s680_s23 = smov [#allocation25] }
 0x1ff   : >>> { %v886_v30 = vmul.f32 %v882_v19, %v875_v21  ;;  %v889_v31 = vmul.f32 %v883_v20, %v875_v21  ;;  %v893_v38 = vmul.f32 %v884_v24, %v875_v21  ;;  %v896_v42 = vmul.f32 %v885_v29, %v875_v21  ;;  %v681_v53 = vld [vmem:[%s680_s23] ss:$0 sm:$0xff]  ;;  %s747_s23 = smov [#allocation18] }
 0x205   : >>> { %v653_v27 = vld [vmem:[%s652_s18] sm:$0xff]  ;;  %s748_s18 = smov [#allocation23] }
 0x206   : >>> { %v877_v28 = vld [vmem:[%s876_s27] sm:$0xff]  ;;  %v666_v32 = vmul.f32 %v661_v23, %v653_v27  ;;  %v668_v33 = vmul.f32 %v658_v22, %v653_v27  ;;  %v663_v39 = vmul.f32 %v660_v17, %v653_v27  ;;  %v671_v43 = vmul.f32 %v659_v16, %v653_v27  ;;  %s678_s27 = smov [#allocation24] }
 0x207   : >>> { %v887_v34 = vmul.f32 %v884_v24, %v877_v28  ;;  %v890_v35 = vmul.f32 %v885_v29, %v877_v28  ;;  %v892_v36 = vmul.f32 %v882_v19, %v877_v28  ;;  %v895_v37 = vmul.f32 %v883_v20, %v877_v28  ;;  %v679_v52 = vld [vmem:[%s678_s27] ss:$0 sm:$0xff]  ;;  %s706_s27 = smov [#allocation15] }
 0x208   : >>> { %v667_v40 = vsub.f32 %v665_v25, %v666_v32  ;;  %v670_v41 = vadd.f32 %v669_v26, %v668_v33  ;;  %v664_v50 = vsub.f32 %v662_v46, %v663_v39  ;;  %v673_v51 = vadd.f32 %v672_v48, %v671_v43  ;;  %v755_v23 = vld [vmem:[%s748_s18] ss:$0 sm:$0xff]  ;;  %s1723_s18 = smov 1  }
 0x209   : >>> { %v888_v44 = vsub.f32 %v886_v30, %v887_v34  ;;  %v891_v45 = vsub.f32 %v889_v31, %v890_v35  ;;  %v894_v47 = vadd.f32 %v893_v38, %v892_v36  ;;  %v897_v49 = vadd.f32 %v896_v42, %v895_v37 }
 0x20a   : >>> { %675 = vst [vmem:[%s1914_s29] sm:$0xff] %v667_v40  ;;  %s1948_s29 = smov [#allocation16] }
 0x20b   : >>> { %676 = vst [vmem:[%s1916_s15] sm:$0xff] %v670_v41  ;;  %s1960_s15 = smov [#allocation15] }
 0x20c   : >>> { %898 = vst [vmem:[%s1919_s30] sm:$0xff] %v888_v44  ;;  %s902_s30 = smov %s1845_s30 }
 0x20d   : >>> { %899 = vst [vmem:[%s1922_s17] sm:$0xff] %v891_v45  ;;  %s1954_s17 = smov %s1850_s17 }
 0x20e   : >>> { %900 = vst [vmem:[%s1927_s25] sm:$0xff] %v894_v47  ;;  %s903_s25 = smov %s1858_s25 }
 0x20f   : >>> { %901 = vst [vmem:[%s1932_s26] sm:$0xff] %v897_v49  ;;  %s1964_s26 = smov %s1862_s26 }
 0x210   : >>> { %674 = vst [vmem:[%s1912_s19] sm:$0xff] %v664_v50  ;;  %s685_s19 = smov [#allocation18] }
 0x211   : >>> { %677 = vst [vmem:[%s1924_s16] sm:$0xff] %v673_v51  ;;  %v687_v55 = vld [vmem:[%s1948_s29] sm:$0xff]  ;;  %s707_s16 = smov [#allocation22] }
 0x212   : >>> { %v688_v54 = vld [vmem:[%s1946_s21] sm:$0xff]  ;;  %v691_v4 = vmul.f32 %v687_v55, %v681_v53  ;;  %v694_v12 = vmul.f32 %v687_v55, %v679_v52 }
 0x213   : >>> { %v904_v56 = vld [vmem:[%s902_s30] ss:$0 sm:$0xff]  ;;  %v1489_v58 = vld [vmem:[%s902_s30 + $0x7] ss:$0 sm:$0xff]  ;;  %v699_v9 = vmul.f32 %v688_v54, %v681_v53  ;;  %v696_v10 = vmul.f32 %v688_v54, %v679_v52 }
 0x214   : >>> { %v1488_v57 = vld [vmem:[%s902_s30 - $0x1] sm:$0xfe]  ;;  %v1493_v62 = vld [vmem:[%s1954_s17 + $0x7] ss:$0 sm:$0xff] }
 0x215   : >>> { %v911_v59 = vsel %vm834_vm10, %v904_v56, %v1488_v57  ;;  %v928_v60 = vld [vmem:[%s1954_s17] ss:$0 sm:$0xff]  ;;  %v1491_v0 = vld [vmem:[%s903_s25 + $0x1] sm:$0x7f] }
 0x216   : >>> { %v1492_v61 = vld [vmem:[%s1954_s17 - $0x1] sm:$0xfe]  ;;  %914 = vst [vmem:[%s902_s30] sm:$0xff] %v911_v59  ;;  %v923_v2 = vsel %vm846_vm11, %v1489_v58, %v1491_v0 }
 0x217   : >>> { %v915_v63 = vld [vmem:[%s903_s25] ss:$0 sm:$0xff]  ;;  %v935_v1 = vsel %vm834_vm10, %v928_v60, %v1492_v61  ;;  %v1495_v3 = vld [vmem:[%s1964_s26 + $0x1] sm:$0x7f] }
 0x218   : >>> { %1490 = vst [vmem:[%s902_s30 + $0x1] sm:$0x1] %v915_v63  ;;  %v939_v7 = vld [vmem:[%s1964_s26] ss:$0 sm:$0xff]  ;;  %v947_v8 = vsel %vm846_vm11, %v1493_v62, %v1495_v3 }
 0x219   : >>> { %925 = vst [vmem:[%s903_s25] sm:$0xff] %v923_v2  ;;  %v686_v11 = vld [vmem:[%s1960_s15] sm:$0xff] }
 0x21a   : >>> { %938 = vst [vmem:[%s1954_s17] sm:$0xff] %v935_v1  ;;  %v689_v13 = vld [vmem:[%s685_s19] sm:$0xff]  ;;  %v690_v14 = vmul.f32 %v686_v11, %v679_v52  ;;  %v693_v15 = vmul.f32 %v686_v11, %v681_v53 }
 0x21b   : >>> { %1494 = vst [vmem:[%s1954_s17 + $0x1] sm:$0x1] %v939_v7  ;;  %v697_v16 = vmul.f32 %v689_v13, %v681_v53  ;;  %v700_v17 = vmul.f32 %v689_v13, %v679_v52  ;;  %v714_v22 = vld [vmem:[%s707_s16] ss:$0 sm:$0xff]  ;;  %s1998_s16 = smov [#allocation17] }
 0x21c   : >>> { %949 = vst [vmem:[%s1964_s26] sm:$0xff] %v947_v8  ;;  %v692_v18 = vsub.f32 %v690_v14, %v691_v4  ;;  %v695_v21 = vadd.f32 %v694_v12, %v693_v15 }
 0x21d   : >>> { %v701_v19 = vadd.f32 %v700_v17, %v699_v9  ;;  %v698_v20 = vsub.f32 %v696_v10, %v697_v16 }
 0x21e   : >>> { %702 = vst [vmem:[%s1960_s15] sm:$0xff] %v692_v18  ;;  %s721_s15 = smov [#allocation16] }
 0x21f   : >>> { %705 = vst [vmem:[%s685_s19] sm:$0xff] %v701_v19  ;;  %s1996_s19 = smov [#allocation18] }
 0x220   : >>> { %704 = vst [vmem:[%s1946_s21] sm:$0xff] %v698_v20  ;;  %s734_s21 = smov [#allocation17] }
 0x221   : >>> { %703 = vst [vmem:[%s1948_s29] sm:$0xff] %v695_v21  ;;  %s1994_s29 = smov [#allocation15] }
 0x225   : >>> { %v715_v24 = vld [vmem:[%s706_s27] sm:$0xff] }
 0x226   : >>> { %v756_v25 = vld [vmem:[%s747_s23] sm:$0xff]  ;;  %v719_v26 = vsel %vm718_vm12, %v714_v22, %v715_v24 }
 0x227   : >>> { %v760_v27 = vsel %vm759_vm13, %v755_v23, %v756_v25  ;;  %v741_v28 = vld [vmem:[%s734_s21] sm:$0xff]  ;;  %720 = vst [vmem:[%s706_s27] sm:$0xff] %v719_v26  ;;  %s763_s27 = smov [#allocation16] }
 0x228   : >>> { %761 = vst [vmem:[%s747_s23] sm:$0xff] %v760_v27  ;;  %v745_v29 = vsel %vm744_vm14, 0.0, %v741_v28  ;;  %v728_v30 = vld [vmem:[%s721_s15] sm:$0xff]  ;;  %s1724_s23 = smov 127  }
 0x229   : >>> { %746 = vst [vmem:[%s734_s21] sm:$0xff] %v745_v29  ;;  %v732_v31 = vsel %vm731_vm15, 0.0, %v728_v30  ;;  %s2006_s21 = smov [#allocation16] }
 0x22a   : >>> { %733 = vst [vmem:[%s721_s15] sm:$0xff] %v732_v31  ;;  %s827_s15 = smov [#allocation17] }
 0x22e   : >>> { %v768_v32 = vld [vmem:[%s1994_s29] sm:$0xff] }
 0x22f   : >>> { %v796_v33 = vld [vmem:[%s1996_s19] sm:$0xff]  ;;  %769 = vrot.lane.b32.xlu1 %v768_v32, %s1723_s18 }
 0x230   : >>> { %797 = vrot.lane.b32.xlu0 %v796_v33, %s1723_s18  ;;  %v800_v34 = vld [vmem:[%s1998_s16] sm:$0xff] }
 0x231   : >>> { %801 = vrot.lane.b32.xlu2 %v800_v34, %s1723_s18  ;;  %v785_v35 = vld [vmem:[%s763_s27] sm:$0xff] }
 0x237   : >>> { %765 = vrot.lane.b32.xlu1 %v785_v35, %s1723_s18  ;;  %s826_s18 = smov [#allocation15] }
 0x239   : >>> { %786 = vrot.lane.b32.xlu2 %v785_v35, %s1724_s23 }
 0x23f   : >>> { %818 = vrot.lane.b32.xlu1 %v796_v33, %s1724_s23  ;;  %s411_s23 = smov (%p467_p9), [#allocation17] }
 0x28b   : >>> { %v802_v36 = vpop.permute.xlu2 %801 }
 0x28c   : >>> { %v806_v44 = vsel %vm773_vm1, %v800_v34, %v802_v36 }
 0x293   : >>> { %v787_v37 = vpop.permute.xlu2 %786 }
 0x294   : >>> { %v791_v38 = vsel %vm790_vm0, %v768_v32, %v787_v37 }
 0x295   : >>> { %793 = vst [vmem:[%s763_s27] sm:$0xff] %v791_v38  ;;  %s394_s27 = smov (%p467_p9), [#allocation16] }
 0x29c   : >>> { %v852_v39 = vld [vmem:[%s2006_s21] ss:$0 sm:$0xff]  ;;  %v1485_v41 = vld [vmem:[%s2006_s21 + $0x7] ss:$0 sm:$0xff] }
 0x29d   : >>> { %v1484_v40 = vld [vmem:[%s2006_s21 - $0x1] sm:$0xfe] }
 0x29e   : >>> { %v859_v42 = vsel %vm834_vm10, %v852_v39, %v1484_v40 }
 0x29f   : >>> { %862 = vst [vmem:[%s2006_s21] sm:$0xff] %v859_v42 }
 0x2a1   : >>> { %v770_v43 = vpop.permute.xlu1 %769 }
 0x2a2   : >>> { %v798_v45 = vpop.permute.xlu0 %797  ;;  %v774_v48 = vsel %vm773_vm1, %v768_v32, %v770_v43 }
 0x2a3   : >>> { %v810_v46 = vsel %vm777_vm3, %v798_v45, %v806_v44 }
 0x2a4   : >>> { %v816_v47 = vsel %vm1349_vm2, %v810_v46, 0.0 }
 0x2a5   : >>> { %824 = vst [vmem:[%s1998_s16] sm:$0xff] %v816_v47  ;;  %s375_s16 = smov (%p467_p9), [#allocation15] }
 0x2a9   : >>> { %v766_v49 = vpop.permute.xlu1 %765 }
 0x2aa   : >>> { %v778_v50 = vsel %vm777_vm3, %v766_v49, %v774_v48 }
 0x2ab   : >>> { %v784_v51 = vsel %vm1349_vm2, %v778_v50, 0.0 }
 0x2ac   : >>> { %792 = vst [vmem:[%s1994_s29] sm:$0xff] %v784_v51  ;;  %v1483_v53 = vld [vmem:[%s827_s15 + $0x1] sm:$0x7f]  ;;  %v839_v60 = vld [vmem:[%s827_s15] ss:$0 sm:$0xff]  ;;  %s851_s29 = smov [#allocation18] }
 0x2b1   : >>> { %v819_v52 = vpop.permute.xlu1 %818 }
 0x2b2   : >>> { %v823_v54 = vsel %vm790_vm0, %v800_v34, %v819_v52 }
 0x2b3   : >>> { %v828_v55 = vld [vmem:[%s826_s18] ss:$0 sm:$0xff]  ;;  %v1481_v57 = vld [vmem:[%s826_s18 + $0x7] ss:$0 sm:$0xff]  ;;  %825 = vst [vmem:[%s1996_s19] sm:$0xff] %v823_v54  ;;  %s950_s19 = sadd.s32 (%p467_p9), 1, %s1716_s24  }
 0x2b4   : >>> { %v1480_v56 = vld [vmem:[%s826_s18 - $0x1] sm:$0xfe]  ;;  %v847_v59 = vsel %vm846_vm11, %v1481_v57, %v1483_v53  ;;  %p463_p10 = scmp.ge.s32.totalorder (%p467_p9), %s950_s19, 15  ;;  %s2184_s24 = smov (%p467_p9), %s950_s19 }
 0x2b5   : >>> { %v835_v58 = vsel %vm834_vm10, %v828_v55, %v1480_v56  ;;  %849 = vst [vmem:[%s827_s15] sm:$0xff] %v847_v59 }
 0x2b6   : >>> { %838 = vst [vmem:[%s826_s18] sm:$0xff] %v835_v58 }
 0x2b7   : >>> { %1482 = vst [vmem:[%s826_s18 + $0x1] sm:$0x1] %v839_v60 }
 0x2ba   : >>> { %v863_v61 = vld [vmem:[%s851_s29] ss:$0 sm:$0xff]  ;;  %v1487_v62 = vld [vmem:[%s851_s29 + $0x1] sm:$0x7f] }
 0x2bb   : >>> { %1486 = vst [vmem:[%s2006_s21 + $0x1] sm:$0x1] %v863_v61  ;;  %v871_v63 = vsel %vm846_vm11, %v1485_v41, %v1487_v62  ;;  %469 = sbr.rel (!%p467_p9) target bundleno = 262 (0x106), region = 360  ;;  %s428_s21 = smov (%p467_p9), [#allocation18] }
 0x2bc   : >>> { %873 = vst [vmem:[%s851_s29] sm:$0xff] %v871_v63  ;;  %v417_v4 = vld [vmem:[%s411_s23] sm:$0xff] (%p467_p9) }
 0x2bd   : >> { %v418_v10 = vsel (%p467_p9), %vm1349_vm2, %v417_v4, 0.0 }
 0x2be   : >> { %v381_v0 = vld [vmem:[%s375_s16] sm:$0xff] (%p467_p9)  ;;  %v419_v12 = vmul.f32 (%p467_p9), %v418_v10, %v418_v10 }
 0x2bf   : >> { %v382_v2 = vsel (%p467_p9), %vm1349_vm2, %v381_v0, 0.0 }
 0x2c0   : >> { %v383_v8 = vmul.f32 %v382_v2, %v382_v2 }
 0x2c2   : >> { %v400_v1 = vld [vmem:[%s394_s27] sm:$0xff]  ;;  %v387_v15 = vsel %vm386_vm4, 0.0, %v383_v8 }
 0x2c3   : >> { %v401_v3 = vsel %vm1349_vm2, %v400_v1, 0.0  ;;  %v434_v7 = vld [vmem:[%s428_s21] sm:$0xff] }
 0x2c4   : >> { %v402_v9 = vmul.f32 %v401_v3, %v401_v3  ;;  %v435_v11 = vsel %vm1349_vm2, %v434_v7, 0.0 }
 0x2c5   : >> { %v436_v14 = vmul.f32 %v435_v11, %v435_v11 }
 0x2c6   : >> { %v404_v13 = vadd.f32 %v402_v9, %v383_v8  ;;  %v403_v17 = vadd.f32 %v402_v9, %v387_v15 }
 0x2c7   : >> { %v440_v20 = vsel %vm439_vm5, 0.0, %v436_v14 }
 0x2c8   : >> { %v421_v16 = vadd.f32 %v419_v12, %v404_v13  ;;  %v420_v19 = vadd.f32 %v419_v12, %v403_v17 }
 0x2ca   : >> { %v442_v18 = vadd.f32 %v436_v14, %v421_v16  ;;  %v441_v21 = vadd.f32 %v440_v20, %v420_v19 }
 0x2cc   : >> { %443 = vadd.xlane.f32.xlu0 %v442_v18 }
 0x2d4   : >> { %451 = vadd.xlane.f32.xlu0 %v441_v21 }
 0x33f   : >> { %v444_v22 = vpop.xlane.xlu0 %443 }
 0x340   : >> { %v445_v23 = vrot.slane %v444_v22, 4 }
 0x342   : >> { %v446_v24 = vadd.f32 %v445_v23, %v444_v22 }
 0x344   : >> { %v447_v25 = vrot.slane %v446_v24, 2 }
 0x346   : >> { %v448_v29 = vadd.f32 %v447_v25, %v446_v24 }
 0x347   : >> { %v452_v26 = vpop.xlane.xlu0 %451 }
 0x348   : >> { %v453_v27 = vrot.slane %v452_v26, 4  ;;  %v449_v32 = vrot.slane %v448_v29, 1 }
 0x34a   : >> { %v454_v28 = vadd.f32 %v453_v27, %v452_v26  ;;  %v450_v35 = vadd.f32 %v449_v32, %v448_v29 }
 0x34c   : >> { %v455_v30 = vrot.slane %v454_v28, 2 }
 0x34e   : >> { %v456_v31 = vadd.f32 %v455_v30, %v454_v28 }
 0x350   : >> { %v457_v33 = vrot.slane %v456_v31, 1 }
 0x352   : >> { %v458_v34 = vadd.f32 %v457_v33, %v456_v31 }
 0x354   : >> { %1514 = vpush %v458_v34 }
 0x355   : >> { %1516 = vpush %v450_v35 }
 0x385   : >> { %s1515_s28 = spop %1514 }
 0x386   : >> { %s1517_s15 = spop %1516 }
 0x387   : >> { %s461_s18 = smul.f32 1e-10, %s1517_s15 }
 0x389   : >> { %p462_p11 = scmp.le.f32.partialorder %s1515_s28, %s461_s18 }
 0x38b   : >> { %p464_p12 = por %p463_p10, %p462_p11 }
 0x38d   : > { %952 = sbr.rel (!%p464_p12) target bundleno = 261 (0x105), region = 371 }
 0x392 PF: > { %s957_s29 = smov [#allocation15]  ;;  %v961_v5 = vmov %v1838_v5  ;;  %v964_v6 = vmov %v1840_v6  ;;  %s977_s16 = smov [#allocation18] }
 0x393   : > { %v981_v5 = vmov %v1838_v5  ;;  %v984_v6 = vmov %v1840_v6  ;;  %v965_v36 = vld [vmem:[%s957_s29] sm:$0xff]  ;;  %vm968_vm6 = vcmp.eq.s32.totalorder %v964_v6, %v961_v5  ;;  %s953_s24 = sand.u32 7, %s1791_s12   ;;  %s2185_s23 = scalar_lea.vmem [#allocation5], %s1836_s22 }
 0x394   : > { %vm988_vm7 = vcmp.eq.s32.totalorder %v984_v6, %v981_v5  ;;  %v969_v37 = vsel %vm968_vm6, %v965_v36, 0.0  ;;  %v985_v39 = vld [vmem:[%s977_s16] sm:$0xff]  ;;  %s954_s19 = scalar_lea.vmem [#allocation4], %s953_s24  ;;  %s956_s27 = scalar_lea.vmem [#allocation6], %s953_s24 }
 0x395   : > { %v970_v38 = vrot.slane %v969_v37, 4  ;;  %v989_v40 = vsel %vm988_vm7, %v985_v39, 0.0  ;;  %s958_s19 = smov %s954_s19  ;;  %s978_s27 = smov %s956_s27 }
 0x396   : > { %v990_v42 = vrot.slane %v989_v40, 4  ;;  %s2186_s21 = scalar_lea.vmem [#allocation7], %s1836_s22  ;;  %s1040_s29 = sshrl.u32 (%p1806_p3), %s1791_s12, 3 }
 0x397   : > { %v971_v41 = vadd.f32 %v970_v38, %v969_v37  ;;  %s2187_s16 = scalar_lea.vmem (%p1806_p3), [#allocation5], %s1836_s22  ;;  %s1502_s24 = sshll.u32 (%p1806_p3), %s1040_s29, 1 }
 0x398   : > { %v991_v44 = vadd.f32 %v990_v42, %v989_v40  ;;  %s1042_s0 = scalar_lea.vmem (%p1806_p3), %s2170_s4, %s1502_s24 }
 0x399   : > { %v972_v43 = vrot.slane %v971_v41, 2 }
 0x39a   : > { %v992_v46 = vrot.slane %v991_v44, 2 }
 0x39b   : > { %v973_v45 = vadd.f32 %v972_v43, %v971_v41 }
 0x39c   : > { %v993_v48 = vadd.f32 %v992_v46, %v991_v44 }
 0x39d   : > { %v974_v47 = vrot.slane %v973_v45, 1 }
 0x39e   : > { %v994_v6 = vrot.slane %v993_v48, 1 }
 0x39f   : > { %v975_v5 = vadd.f32 %v974_v47, %v973_v45 }
 0x3a0   : > { %v995_v49 = vadd.f32 %v994_v6, %v993_v48 }
 0x3a1   : > { %976 = vst [vmem:[%s958_s19] sm:$0x1] %v975_v5 }
 0x3a2   : > { %996 = vst [vmem:[%s978_s27] sm:$0x1] %v995_v49 }
 0x3a6   : > { %1039 = sbr.rel (!%p1806_p3) target bundleno = 946 (0x3b2), region = 174 }
 0x3a8   : > { %v999_v50 = vld [vmem:[#allocation4] sm:$0x3] }
 0x3a9   : > { %1002 = vst [vmem:[%s2185_s23] sm:$0x3] %v999_v50  ;;  %v1005_v51 = vld [vmem:[#allocation6] sm:$0x3] }
 0x3aa   : > { %1008 = vst [vmem:[%s2186_s21] sm:$0x3] %v1005_v51 }
 0x3b0   : > { %v1059_v52 = vld [vmem:[%s2187_s16] sm:$0x3] }
 0x3b1   : > { %1060 = vst [vmem:[%s1042_s0] sm:$0x3] %v1059_v52 }
 0x3b2 PF: > { %1078 = sbr.rel (!%p1806_p3) target bundleno = 954 (0x3ba), region = 208  ;;  %s1079_s23 = sshrl.u32 (%p1806_p3), %s1791_s12, 3 }
 0x3b3   : > { %s2188_s21 = scalar_lea.vmem (%p1806_p3), [#allocation7], %s1836_s22  ;;  %s1503_s18 = sshll.u32 (%p1806_p3), %s1079_s23, 1 }
 0x3b4   : > { %s1081_s16 = scalar_lea.vmem (%p1806_p3), %s2171_s5, %s1503_s18 }
 0x3b8   : > { %v1098_v53 = vld [vmem:[%s2188_s21] sm:$0x3] }
 0x3b9   : > { %1099 = vst [vmem:[%s1081_s16] sm:$0x3] %v1098_v53 }
 0x3ba PF: > { %s2088_s0 = sshll.u32 %s1791_s12, 3  ;;  %s1131_s20 = sshll.u32 %s1850_s17, 4  ;;  %s1132_s20 = int_to_ptr.vmem [resolvable:$true] %s1131_s20 }
 0x3bb   : > { %s1129_s22 = scalar_lea.hbm %s2173_s7, %s2088_s0  ;;  %s1118_s28 = scalar_lea.hbm %s2172_s6, %s2088_s0 }
 0x3bc   : > { %s1133_s19 = sshll.u32 %s1129_s22, 4  ;;  %s1120_s15 = sshll.u32 %s1845_s30, 4  ;;  %s1134_s19 = int_to_ptr.hbm [resolvable:$true] %s1133_s19  ;;  %s1121_s15 = int_to_ptr.vmem [resolvable:$true] %s1120_s15 }
 0x3bd   : > { %s1586_s18 = sshra.s32 %s1134_s19, 4  ;;  %s1590_s17 = scalar_lea.hbm %s2173_s7, 16  ;;  %s1587_s18 = int_to_ptr.hbm [resolvable:$true] %s1586_s18 }
 0x3be   : > { %s1588_s21 = scalar_lea.hbm %s1587_s18, 8  ;;  %p1591_p0 = scmp.lt.s32.totalorder %s1587_s18, %s2173_s7 }
 0x3bf   : > { %p1589_p13 = scmp.ne.s32.totalorder %s1587_s18, %s1588_s21  ;;  %p1592_p1 = scmp.lt.s32.totalorder %s1590_s17, %s1588_s21 }
 0x3c1   : > { %p1593_p2 = por %p1592_p1, %p1591_p0 }
 0x3c3   : > { %p1594_p3 = pnand %p1593_p2, %p1589_p13 }
 0x3c5   : > { %1597 = shalt.err (!%p1594_p3)
}
 0x3c6   : > { %s2189_s29 = scalar_lea.sflag [#allocation11], %s1830_s13  ;;  %s1122_s30 = sshll.u32 %s1118_s28, 4  ;;  %s1123_s30 = int_to_ptr.hbm [resolvable:$true] %s1122_s30 }
 0x3c7   : > { %1136 = dma.vmem_to_hbm [thread:$0]  %s1132_s20, 128, %s1134_s19, %s2189_s29  }
 0x3c8   : > { %s1140_s27 = scalar_lea.hbm %s2174_s8, %s2088_s0  ;;  %s1610_s23 = sshra.s32 %s1123_s30, 4  ;;  %s1611_s23 = int_to_ptr.hbm [resolvable:$true] %s1610_s23 }
 0x3c9   : > { %s1612_s12 = scalar_lea.hbm %s1611_s23, 8  ;;  %s1614_s18 = scalar_lea.hbm %s2172_s6, 16 }
 0x3ca   : > { %p1613_p5 = scmp.ne.s32.totalorder %s1611_s23, %s1612_s12  ;;  %p1615_p6 = scmp.lt.s32.totalorder %s1611_s23, %s2172_s6 }
 0x3cb   : > { %p1616_p7 = scmp.lt.s32.totalorder %s1614_s18, %s1612_s12 }
 0x3cd   : > { %p1617_p8 = por %p1616_p7, %p1615_p6 }
 0x3cf   : > { %p1618_p9 = pnand %p1617_p8, %p1613_p5 }
 0x3d1   : > { %1621 = shalt.err (!%p1618_p9)
}
 0x3d2   : > { %s2190_s20 = scalar_lea.sflag [#allocation9], %s1830_s13  ;;  %s1142_s19 = sshll.u32 %s1858_s25, 4  ;;  %s1143_s19 = int_to_ptr.vmem [resolvable:$true] %s1142_s19 }
 0x3d3   : > { %1125 = dma.vmem_to_hbm [thread:$0]  %s1121_s15, 128, %s1123_s30, %s2190_s20  }
 0x3d4   : > { %s1144_s28 = sshll.u32 %s1140_s27, 4  ;;  %s1638_s23 = scalar_lea.hbm %s2174_s8, 16  ;;  %s1145_s28 = int_to_ptr.hbm [resolvable:$true] %s1144_s28 }
 0x3d5   : > { %s1634_s17 = sshra.s32 %s1145_s28, 4  ;;  %s1635_s17 = int_to_ptr.hbm [resolvable:$true] %s1634_s17 }
 0x3d6   : > { %s1636_s29 = scalar_lea.hbm %s1635_s17, 8  ;;  %p1639_p11 = scmp.lt.s32.totalorder %s1635_s17, %s2174_s8 }
 0x3d7   : > { %p1637_p10 = scmp.ne.s32.totalorder %s1635_s17, %s1636_s29  ;;  %p1640_p12 = scmp.lt.s32.totalorder %s1638_s23, %s1636_s29 }
 0x3d9   : > { %p1641_p13 = por %p1640_p12, %p1639_p11 }
 0x3db   : > { %p1642_p0 = pnand %p1641_p13, %p1637_p10 }
 0x3dd   : > { %1645 = shalt.err (!%p1642_p0)
}
 0x3de   : > { %s2191_s25 = scalar_lea.sflag [#allocation11], %s1830_s13  ;;  %s1151_s27 = scalar_lea.hbm %s2175_s9, %s2088_s0 }
 0x3df   : > { %1147 = dma.vmem_to_hbm [thread:$0]  %s1143_s19, 128, %s1145_s28, %s2191_s25  }
 0x3e0   : > { %s1153_s2 = sshll.u32 %s1862_s26, 4  ;;  %s1155_s18 = sshll.u32 %s1151_s27, 4  ;;  %s1154_s2 = int_to_ptr.vmem [resolvable:$true] %s1153_s2  ;;  %s1156_s18 = int_to_ptr.hbm [resolvable:$true] %s1155_s18 }
 0x3e1   : > { %s1658_s21 = sshra.s32 %s1156_s18, 4  ;;  %s1662_s29 = scalar_lea.hbm %s2175_s9, 16  ;;  %s1659_s21 = int_to_ptr.hbm [resolvable:$true] %s1658_s21 }
 0x3e2   : > { %s1660_s16 = scalar_lea.hbm %s1659_s21, 8  ;;  %p1663_p2 = scmp.lt.s32.totalorder %s1659_s21, %s2175_s9 }
 0x3e3   : > { %p1661_p1 = scmp.ne.s32.totalorder %s1659_s21, %s1660_s16  ;;  %p1664_p3 = scmp.lt.s32.totalorder %s1662_s29, %s1660_s16 }
 0x3e5   : > { %p1665_p5 = por %p1664_p3, %p1663_p2 }
 0x3e7   : > { %p1666_p6 = pnand %p1665_p5, %p1661_p1 }
 0x3e9   : > { %1669 = shalt.err (!%p1666_p6)
}
 0x3ea   : > { %s2192_s26 = scalar_lea.sflag [#allocation14], %s1830_s13 }
 0x3eb   : > { %1158 = dma.vmem_to_hbm [thread:$0]  %s1154_s2, 128, %s1156_s18, %s2192_s26  }
 0x3ec PF: > { %s2193_s0 = sadd.s32 4294967294, %s1712_s11  }
 0x3ed   : > { %s1178_s19 = sand.u32 1, %s2193_s0  }
 0x3ee   : > { %s1179_s28 = scalar_lea.sflag [#allocation9], %s1178_s19 }
 0x3ef   : > { %1691 = dma.done.wait (%p1460_p4), %s1179_s28, 128  }
 0x3f0   : > { %1693 = vsyncadd (%p1460_p4), %s1179_s28, 4294967168  ;;  %s1186_s23 = scalar_lea.sflag [#allocation11], %s1178_s19 }
 0x3f1   : > { %1695 = dma.done.wait (%p1460_p4), %s1186_s23, 256  }
 0x3f2   : > { %1697 = vsyncadd (%p1460_p4), %s1186_s23, 4294967040  ;;  %s1200_s13 = scalar_lea.sflag [#allocation14], %s1178_s19 }
 0x3f3   : > { %1699 = dma.done.wait (%p1460_p4), %s1200_s13, 128  }
 0x3f4   : > { %1701 = vsyncadd (%p1460_p4), %s1200_s13, 4294967168  ;;  %s2194_s12 = sld [smem:[#allocation31_spill]]  ;;  %p22_p7 = scmp.ge.s32.totalorder %s1795_s14, 4  }
 0x3f5   : > { %s2195_s30 = smov %s1708_s10  ;;  %s2197_s11 = smov %s1795_s14 }
 0x3f6   :  { %24 = sbr.rel (!%p22_p7) target bundleno = 11 (0xb), region = 382 }
 0x3fa   : > { %s2196_s10 = smov %s2194_s12 }
 0x3fb   :  { %1206 = vsyncpa [#allocation9], 1 }
 0x3fc   :  { %1208 = vsyncpa [#allocation9 + $0x1], 1 }
 0x3fd   :  { %1209 = vsyncpa [#allocation11], 1 }
 0x3fe   :  { %1211 = vsyncpa [#allocation11 + $0x1], 1 }
 0x3ff   :  { %1212 = vsyncpa [#allocation14], 1 }
 0x400   :  { %1214 = vsyncpa [#allocation14 + $0x1], 1 }

// kernel: low_rank_loss.1
= control target key start
LH: loop header
LB: loop body
LE: loop exit
PB: predicated region body
PF: predicated region fallthrough
CT: control target
= control target key end

     0   :  { %s553_s12 = smov 0   ;;  %s555_s13 = smov 0   ;;  %s610_s0 = inlined_call_operand.vmem [shape: f32[2,4,256], index: 0, kind: input, shape index: {}]   ;;  %s611_s1 = inlined_call_operand.vmem [shape: f32[2,4,256], index: 1, kind: input, shape index: {}]   ;;  %s612_s2 = inlined_call_operand.vmem [shape: f32[2,1,256], index: 2, kind: output, shape index: {0}]   ;;  %s613_s3 = inlined_call_operand.vmem [shape: f32[2,1,256], index: 3, kind: output, shape index: {1}]  }
   0x1   :  { %s557_s14 = smov 0  }
   0x2 LB: > { %s26_s15 = sadd.s32 1, %s527_s13  ;;  %p470_p0 = scmp.ge.s32.totalorder %s531_s14, 1  ;;  %s531_s14 = sphi %s557_s14, %s14_s14   ;;  %s527_s13 = sphi %s555_s13, %s617_s13   ;;  %s523_s12 = sphi %s553_s12, %s616_s12  }
   0x3   : > { %p28_p1 = scmp.ge.s32.totalorder %s26_s15, 2  ;;  %p174_p2 = scmp.lt.s32.totalorder %s531_s14, 3 }
   0x5   : > { %s619_s15 = smov (%p28_p1, %s26_s15), 0  ;;  %p175_p3 = pnand %p470_p0, %p174_p2 }
   0x6   : > { %p214_p4 = scmp.lt.s32.totalorder (!%p175_p3), %s523_s12, 1 }
   0x7   : > { %178 = sbr.rel (%p175_p3) target bundleno = 193 (0xc1), region = 28 }
   0xc   : > { %s621_s12 = smov (!%p214_p4, %s523_s12), 1  ;;  %vm247_vm0 = vcmask 1043456   ;;  %v320_v56 = vlaneseq  ;;  %vm317_vm4 = vcmask 1040384  }
   0xd   : > { %s479_s16 = sshll.u32 %s621_s12, 3  ;;  %s475_s23 = sshll.u32 %s621_s12, 1 }
   0xe   : > { %s222_s19 = scalar_lea.vmem %s610_s0, %s479_s16  ;;  %s231_s22 = scalar_lea.vmem %s611_s1, %s479_s16  ;;  %vm588_vm5 = vcmp.lt.s32.totalorder %v320_v56, 256 }
   0xf   : > { %v240_v0 = vld [vmem:[%s222_s19] sm:$0xff]  ;;  %s235_s26 = scalar_lea.vmem %s612_s2, %s475_s23  ;;  %s239_s29 = scalar_lea.vmem %s613_s3, %s475_s23 }
  0x10   : > { %242 = vst [vmem:[#allocation1] ss:$2 sm:$0xff] %v240_v0  ;;  %v264_v1 = vld [vmem:[%s231_s22] sm:$0xff] }
  0x17   : > { %v243_v2 = vld.sshfl [vmem:[#allocation1] sm:$0xff pattern:$0x75316420]  ;;  %v244_v3 = vld.sshfl [vmem:[#allocation1 + $0x8] sm:$0xff pattern:$0x75316420] }
  0x18   : > { %v248_v4 = vsel %vm247_vm0, %v243_v2, 0.0  ;;  %v255_v5 = vsel %vm247_vm0, %v244_v3, 0.0  ;;  %266 = vst [vmem:[#allocation1] ss:$2 sm:$0xff] %v264_v1 }
  0x19   : > { %v249_v6 = vrot.slane %v248_v4, 4  ;;  %v256_v7 = vrot.slane %v255_v5, 4 }
  0x1b   : > { %v250_v8 = vadd.f32 %v249_v6, %v248_v4  ;;  %v257_v9 = vadd.f32 %v256_v7, %v255_v5 }
  0x1d   : > { %v251_v10 = vrot.slane %v250_v8, 2  ;;  %v258_v11 = vrot.slane %v257_v9, 2 }
  0x1f   : > { %v252_v12 = vadd.f32 %v251_v10, %v250_v8  ;;  %v259_v13 = vadd.f32 %v258_v11, %v257_v9  ;;  %v267_v14 = vld.sshfl [vmem:[#allocation1] sm:$0xff pattern:$0x75316420]  ;;  %v268_v15 = vld.sshfl [vmem:[#allocation1 + $0x8] sm:$0xff pattern:$0x75316420] }
  0x20   : > { %v271_v16 = vsel %vm247_vm0, %v267_v14, 0.0  ;;  %v278_v17 = vsel %vm247_vm0, %v268_v15, 0.0 }
  0x21   : > { %v253_v18 = vrot.slane %v252_v12, 1  ;;  %v260_v19 = vrot.slane %v259_v13, 1  ;;  %v272_v20 = vrot.slane %v271_v16, 4  ;;  %v279_v21 = vrot.slane %v278_v17, 4 }
  0x23   : > { %v254_v22 = vadd.f32 %v253_v18, %v252_v12  ;;  %v261_v23 = vadd.f32 %v260_v19, %v259_v13  ;;  %v273_v24 = vadd.f32 %v272_v20, %v271_v16  ;;  %v280_v25 = vadd.f32 %v279_v21, %v278_v17 }
  0x25   : > { %v287_v26 = vmul.f32 0.25, %v254_v22  ;;  %v288_v27 = vmul.f32 0.25, %v261_v23  ;;  %v274_v28 = vrot.slane %v273_v24, 2  ;;  %v281_v29 = vrot.slane %v280_v25, 2 }
  0x27   : > { %v291_v30 = vmul.f32 %v287_v26, %v287_v26  ;;  %v292_v31 = vmul.f32 %v288_v27, %v288_v27  ;;  %v275_v32 = vadd.f32 %v274_v28, %v273_v24  ;;  %v282_v33 = vadd.f32 %v281_v29, %v280_v25 }
  0x29   : > { %v293_v34 = vadd.f32 %v292_v31, %v291_v30  ;;  %v276_v35 = vrot.slane %v275_v32, 1  ;;  %v283_v36 = vrot.slane %v282_v33, 1 }
  0x2b   : > { %294 = vadd.xlane.f32.xlu0 %v293_v34  ;;  %v277_v37 = vadd.f32 %v276_v35, %v275_v32  ;;  %v284_v38 = vadd.f32 %v283_v36, %v282_v33 }
  0x2d   : > { %v289_v39 = vmul.f32 0.25, %v277_v37  ;;  %v290_v40 = vmul.f32 0.25, %v284_v38 }
  0x2f   : > { %v296_v41 = vmul.f32 %v289_v39, %v289_v39  ;;  %v297_v42 = vmul.f32 %v290_v40, %v290_v40 }
  0x31   : > { %v298_v43 = vadd.f32 %v297_v42, %v296_v41 }
  0x33   : > { %299 = vadd.xlane.f32.xlu0 %v298_v43 }
  0x9e   : > { %v295_v44 = vpop.xlane.xlu0 %294 }
  0x9f   : > { %v301_v45 = vadd.f32 1e-12, %v295_v44 }
  0xa1   : > { %505 = vrsqrt.f32 %v301_v45  ;;  %vm308_vm2 = vweird.f32 %v301_v45 }
  0xa6   : > { %v300_v46 = vpop.xlane.xlu0 %299 }
  0xa7   : > { %v506_v47 = vpop.eup %505  ;;  %v325_v48 = vadd.f32 1e-12, %v300_v46 }
  0xa8   : > { %v303_v49 = vmul.f32 %v506_v47, %v301_v45  ;;  %vm309_vm1 = vweird.f32 %v506_v47 }
  0xa9   : > { %507 = vrsqrt.f32 %v325_v48  ;;  %vm310_vm3 = vmor %vm308_vm2, %vm309_vm1  ;;  %vm332_vm7 = vweird.f32 %v325_v48 }
  0xaa   : > { %v304_v50 = vmul.f32 %v506_v47, %v303_v49 }
  0xac   : > { %v305_v51 = vmul.f32 0.5, %v304_v50 }
  0xae   : > { %v306_v52 = vsub.f32 1.5, %v305_v51 }
  0xaf   : > { %v508_v53 = vpop.eup %507 }
  0xb0   : > { %v307_v54 = vmul.f32 %v506_v47, %v306_v52  ;;  %v327_v55 = vmul.f32 %v508_v53, %v325_v48  ;;  %vm333_vm6 = vweird.f32 %v508_v53 }
  0xb1   : > { %vm334_vm8 = vmor %vm332_vm7, %vm333_vm6 }
  0xb2   : > { %v311_v57 = vsel %vm310_vm3, %v506_v47, %v307_v54  ;;  %v328_v58 = vmul.f32 %v508_v53, %v327_v55 }
  0xb3   : > { %v313_v59 = vmul.f32 %v311_v57, %v288_v27  ;;  %v312_v62 = vmul.f32 %v311_v57, %v287_v26 }
  0xb4   : > { %v329_v60 = vmul.f32 0.5, %v328_v58 }
  0xb5   : > { %v316_v63 = vrot.slane %v313_v59, 7 }
  0xb6   : > { %v330_v0 = vsub.f32 1.5, %v329_v60 }
  0xb7   : > { %v318_v1 = vsel %vm317_vm4, %v312_v62, %v316_v63 }
  0xb8   : > { %324 = vst.msk [vmem:[%s235_s26] sm:$0x3] %vm588_vm5, %v318_v1  ;;  %v331_v2 = vmul.f32 %v508_v53, %v330_v0 }
  0xba   : > { %v335_v3 = vsel %vm334_vm8, %v508_v53, %v331_v2 }
  0xbb   : > { %v337_v4 = vmul.f32 %v335_v3, %v290_v40  ;;  %v336_v5 = vmul.f32 %v335_v3, %v289_v39 }
  0xbd   : > { %v340_v6 = vrot.slane %v337_v4, 7 }
  0xbf   : > { %v341_v7 = vsel %vm317_vm4, %v336_v5, %v340_v6 }
  0xc0   : > { %343 = vst.msk [vmem:[%s239_s29] sm:$0x3] %vm588_vm5, %v341_v7 }
  0xc1 PF: > { %s14_s14 = sadd.s32 1, %s531_s14   ;;  %s616_s12 = smov %s527_s13 }
  0xc2   : > { %p11_p5 = scmp.ge.s32.totalorder %s14_s14, 4   ;;  %s617_s13 = smov %s619_s15 }
  0xc4   :  { %13 = sbr.rel (!%p11_p5) target bundleno = 2 (0x2), region = 73 }

</bundles_post_ra>
